<compile_context>
chip_gen: v7x
topology: tpu7x:2x2x1
jax: 0.10.0
libtpu: 0.0.40
codegen_flags: <defaults>
</compile_context>

<pallas_src>
import functools

import jax
import jax.numpy as jnp
from jax.experimental import pallas as pl
from jax.experimental.pallas import tpu as pltpu


def _round_up(x, m):
    return (x + m - 1) // m * m


def _conv_bn_lrelu_kernel(w_ref, patches_ref, o_ref, mom1_ref, mom2_ref, *,
                          inv_m, eps, slope):
    phase = pl.program_id(0)   # 0: accumulate BN stats, 1: normalize + store
    tile = pl.program_id(1)    # M-tile index

    @pl.when(jnp.logical_and(phase == 0, tile == 0))
    def _init():
        mom1_ref[...] = jnp.zeros_like(mom1_ref)   # per-channel sum
        mom2_ref[...] = jnp.zeros_like(mom2_ref)   # per-channel sum of squares

    # Conv as a matmul on the MXU: (C, K) @ (K, TM) -> (C, TM), f32 accumulate.
    y = jnp.dot(w_ref[...], patches_ref[...], preferred_element_type=jnp.float32)

    @pl.when(phase == 0)
    def _accumulate():
        mom1_ref[...] += jnp.sum(y, axis=1, keepdims=True)
        mom2_ref[...] += jnp.sum(y * y, axis=1, keepdims=True)

    @pl.when(jnp.logical_and(phase == 1, tile == 0))
    def _finalize_stats():
        # BatchNorm2d(affine=False), training mode: biased batch statistics
        # over all N*OH*OW positions, eps = 1e-5.  inv_m = 1 / (true M).
        # Repurpose the scratch refs: mom1 <- mean, mom2 <- inv_std.
        mean = mom1_ref[...] * inv_m
        var = jnp.maximum(mom2_ref[...] * inv_m - mean * mean, 0.0)
        mom1_ref[...] = mean
        mom2_ref[...] = jax.lax.rsqrt(var + eps)

    @pl.when(phase == 1)
    def _normalize():
        y_hat = (y - mom1_ref[...]) * mom2_ref[...]
        # LeakyReLU(0.1); lane-dense store (lanes = M, sublanes = channels).
        o_ref[...] = jnp.where(y_hat >= 0, y_hat, slope * y_hat).astype(o_ref.dtype)


def _im2col_kc_m(x_nchw, k, stride, padding):
    """Pure-JAX glue: (N,C,H,W) -> patches (k*k*C, N*OH*OW); row = (i*k+j)*C + c."""
    if padding > 0:
        x_nchw = jnp.pad(
            x_nchw, ((0, 0), (0, 0), (padding, padding), (padding, padding))
        )
    n, c, h, w = x_nchw.shape
    oh = (h - k) // stride + 1
    ow = (w - k) // stride + 1
    cols = []
    for i in range(k):
        for j in range(k):
            cols.append(
                x_nchw[:, :, i : i + stride * oh : stride, j : j + stride * ow : stride]
            )
    patches = jnp.stack(cols, axis=0)                    # (k*k, N, C, OH, OW)
    patches = jnp.transpose(patches, (0, 2, 1, 3, 4))    # (k*k, C, N, OH, OW)
    return patches.reshape(k * k * c, n * oh * ow), (n, oh, ow)


def conv_module_forward(x_nchw, weight_oikk, *, kernel_size=3, stride=1, padding=0,
                        tile_m=512, eps=1e-5, slope=0.1):
    """Forward pass of the `conv` module. x: NCHW, weight: (outch, inch, k, k)."""
    outch, inch, k, _ = weight_oikk.shape
    assert k == kernel_size
    if padding is None:
        padding = (kernel_size - 1) // 2

    # NCHW im2col stays as XLA glue.
    # TODO(synk): fuse patch extraction into the kernel (k*k shifted-slice
    # matmuls with halo DMA) to remove the k*k HBM read amplification of the
    # materialized im2col matrix.
    patches, (n, oh, ow) = _im2col_kc_m(x_nchw.astype(jnp.float32), k, stride, padding)
    kdim, m = patches.shape

    c_rows = _round_up(outch, 8)                 # channels on sublanes (pad to 8)
    tile_m = min(tile_m, _round_up(m, 128))      # lanes = M, tile multiple of 128
    m_pad = _round_up(m, tile_m)                 # zero cols add nothing to BN sums
    n_tiles = m_pad // tile_m

    # (outch, inch, k, k) -> (outch, k, k, inch) -> (outch, k*k*inch); column
    # order matches the patch row order (i*k + j)*inch + c.
    w_t = jnp.transpose(weight_oikk, (0, 2, 3, 1)).reshape(outch, k * k * inch)
    w_t = jnp.pad(w_t, ((0, c_rows - outch), (0, 0))).astype(jnp.bfloat16)

    # bf16 inputs to the MXU (halves DMA / VMEM); BN math stays f32 in-kernel.
    patches = jnp.pad(patches, ((0, 0), (0, m_pad - m))).astype(jnp.bfloat16)

    kernel = functools.partial(
        _conv_bn_lrelu_kernel,
        inv_m=1.0 / float(m), eps=float(eps), slope=float(slope),
    )

    cost = pl.CostEstimate(
        flops=2 * 2 * c_rows * kdim * m_pad,                  # matmul done twice
        transcendentals=c_rows,                               # one rsqrt pass
        bytes_accessed=2 * patches.size * 2 + w_t.size * 2 + c_rows * m_pad * 4,
    )

    out_cm = pl.pallas_call(
        kernel,
        out_shape=jax.ShapeDtypeStruct((c_rows, m_pad), jnp.float32),
        grid_spec=pltpu.PrefetchScalarGridSpec(
            num_scalar_prefetch=0,
            grid=(2, n_tiles),                                # (phase, M tile)
            in_specs=[
                pl.BlockSpec((c_rows, kdim), lambda p, i: (0, 0)),   # weight resident
                pl.BlockSpec((kdim, tile_m), lambda p, i: (0, i)),
            ],
            # Phase 0 parks the output on block 0 (never written, no writeback
            # churn); phase 1 walks the real blocks.  Block indices stay
            # monotonic, so no output block is revisited after being flushed.
            out_specs=pl.BlockSpec((c_rows, tile_m), lambda p, i: (0, i * p)),
            scratch_shapes=[
                pltpu.VMEM((c_rows, 1), jnp.float32),   # sum   -> mean
                pltpu.VMEM((c_rows, 1), jnp.float32),   # sumsq -> inv_std
            ],
        ),
        compiler_params=pltpu.CompilerParams(
            # Global BN reduction over M: both axes must run sequentially.
            dimension_semantics=("arbitrary", "arbitrary"),
        ),
        cost_estimate=cost,
    )(w_t, patches)

    # (C_pad, M_pad) -> (outch, M) -> (outch, N, OH, OW) -> NCHW
    out = out_cm[:outch, :m].reshape(outch, n, oh, ow)
    return jnp.transpose(out, (1, 0, 2, 3))


def _reference_forward(x_nchw, weight, *, stride, padding, eps=1e-5, slope=0.1):
    """Pure-JAX f32 reference of Conv2d(bias=False) + BN(train, affine=False) + LeakyReLU."""
    y = jax.lax.conv_general_dilated(
        x_nchw, weight, window_strides=(stride, stride),
        padding=[(padding, padding), (padding, padding)],
        dimension_numbers=("NCHW", "OIHW", "NCHW"),
    )
    mean = jnp.mean(y, axis=(0, 2, 3), keepdims=True)
    var = jnp.mean((y - mean) ** 2, axis=(0, 2, 3), keepdims=True)
    y = (y - mean) * jax.lax.rsqrt(var + eps)
    return jnp.where(y >= 0, y, slope * y)


if __name__ == "__main__":
    key = jax.random.PRNGKey(0)
    kx, kw = jax.random.split(key)

    # Module config consistent with conv(inch=4, outch=8) and defaults
    # (kernel_size=3, stride=1, padding=0).
    inch, outch, k, stride, padding = 4, 8, 3, 1, 0

    x = jax.random.normal(kx, (2, inch, 16, 16), dtype=jnp.float32)       # NCHW
    weight = 0.1 * jax.random.normal(kw, (outch, inch, k, k), dtype=jnp.float32)

    y = conv_module_forward(x, weight, kernel_size=k, stride=stride, padding=padding)
    jax.block_until_ready(y)
    assert y.shape == (2, outch, 14, 14), y.shape

    # Sanity check against an f32 XLA reference (loose tolerance: matmul inputs
    # are fed to the MXU in bf16, BN/LeakyReLU math is f32).
    y_ref = _reference_forward(x, weight, stride=stride, padding=padding)
    max_err = float(jnp.max(jnp.abs(y - y_ref)))
    assert max_err < 1e-1, f"max abs err {max_err}"

    print("KERNEL_OK")
</pallas_src>

<mosaic_0001>
module attributes {stable_mosaic.version = 11 : i64} {
  func.func @_conv_bn_lrelu_kernel(%arg0: i32, %arg1: i32, %arg2: memref<8x36xbf16, #tpu.memory_space<vmem>>, %arg3: memref<36x512xbf16, #tpu.memory_space<vmem>>, %arg4: memref<8x512xf32, #tpu.memory_space<vmem>>, %arg5: memref<8x1xf32, #tpu.memory_space<vmem>>, %arg6: memref<8x1xf32, #tpu.memory_space<vmem>>) attributes {dimension_semantics = [#tpu.dimension_semantics<arbitrary>, #tpu.dimension_semantics<arbitrary>], iteration_bounds = array<i64: 2, 1>, scalar_prefetch = 0 : i64, scratch_operands = 2 : i64, tpu.core_type = #tpu.core_type<tc>, window_params = [{pipeline_mode = #tpu.pipeline_mode<synchronous>, transform_indices = @transform_0, window_bounds = array<i64: 8, 36>}, {transform_indices = @transform_1, window_bounds = array<i64: 36, 512>}, {transform_indices = @transform_2, window_bounds = array<i64: 8, 512>}]} {
    %c0_i32 = arith.constant 0 : i32
    %0 = arith.cmpi eq, %arg0, %c0_i32 : i32
    %c0_i32_0 = arith.constant 0 : i32
    %1 = arith.cmpi eq, %arg1, %c0_i32_0 : i32
    %2 = arith.andi %0, %1 : i1
    %3 = arith.extui %2 : i1 to i32
    %c0_i32_1 = arith.constant 0 : i32
    %4 = arith.cmpi ne, %3, %c0_i32_1 : i32
    scf.if %4 {
      %cst_11 = arith.constant 0.000000e+00 : f32
      %19 = vector.broadcast %cst_11 : f32 to vector<8x1xf32>
      %c0_12 = arith.constant 0 : index
      %c0_13 = arith.constant 0 : index
      %20 = vector.load %arg5[%c0_12, %c0_13] : memref<8x1xf32, #tpu.memory_space<vmem>>, vector<8x1xf32>
      tpu.vector_store %arg5[%c0_12, %c0_13], %19 {strides = array<i32>} : memref<8x1xf32, #tpu.memory_space<vmem>>, vector<8x1xf32>,
      %cst_14 = arith.constant 0.000000e+00 : f32
      %21 = vector.broadcast %cst_14 : f32 to vector<8x1xf32>
      %c0_15 = arith.constant 0 : index
      %c0_16 = arith.constant 0 : index
      %22 = vector.load %arg6[%c0_15, %c0_16] : memref<8x1xf32, #tpu.memory_space<vmem>>, vector<8x1xf32>
      tpu.vector_store %arg6[%c0_15, %c0_16], %21 {strides = array<i32>} : memref<8x1xf32, #tpu.memory_space<vmem>>, vector<8x1xf32>,
    } else {
    }
    %c0 = arith.constant 0 : index
    %c0_2 = arith.constant 0 : index
    %5 = vector.load %arg2[%c0, %c0_2] : memref<8x36xbf16, #tpu.memory_space<vmem>>, vector<8x36xbf16>
    %c0_3 = arith.constant 0 : index
    %c0_4 = arith.constant 0 : index
    %6 = vector.load %arg3[%c0_3, %c0_4] : memref<36x512xbf16, #tpu.memory_space<vmem>>, vector<36x512xbf16>
    %cst = arith.constant dense<0.000000e+00> : vector<8x512xf32>
    %7 = tpu.matmul %5, %6, %cst {dimension_numbers = #tpu.dot_dimension_numbers<[1], [0], [0], [1], [0, 0, 1, 1], [], []>} : vector<8x36xbf16>, vector<36x512xbf16>, vector<8x512xf32> -> vector<8x512xf32>
    %c0_i32_5 = arith.constant 0 : i32
    %8 = arith.cmpi eq, %arg0, %c0_i32_5 : i32
    %9 = arith.extui %8 : i1 to i32
    %c0_i32_6 = arith.constant 0 : i32
    %10 = arith.cmpi ne, %9, %c0_i32_6 : i32
    scf.if %10 {
      %c0_11 = arith.constant 0 : index
      %c0_12 = arith.constant 0 : index
      %19 = vector.load %arg5[%c0_11, %c0_12] : memref<8x1xf32, #tpu.memory_space<vmem>>, vector<8x1xf32>
      %cst_13 = arith.constant dense<0.000000e+00> : vector<8xf32>
      %20 = vector.multi_reduction <add>, %7, %cst_13 [1] : vector<8x512xf32> to vector<8xf32>
      %21 = vector.shape_cast %20 : vector<8xf32> to vector<8x1xf32>
      %22 = arith.addf %19, %21 : vector<8x1xf32>
      %c0_14 = arith.constant 0 : index
      %c0_15 = arith.constant 0 : index
      %23 = vector.load %arg5[%c0_14, %c0_15] : memref<8x1xf32, #tpu.memory_space<vmem>>, vector<8x1xf32>
      tpu.vector_store %arg5[%c0_14, %c0_15], %22 {strides = array<i32>} : memref<8x1xf32, #tpu.memory_space<vmem>>, vector<8x1xf32>,
      %c0_16 = arith.constant 0 : index
      %c0_17 = arith.constant 0 : index
      %24 = vector.load %arg6[%c0_16, %c0_17] : memref<8x1xf32, #tpu.memory_space<vmem>>, vector<8x1xf32>
      %25 = arith.mulf %7, %7 : vector<8x512xf32>
      %cst_18 = arith.constant dense<0.000000e+00> : vector<8xf32>
      %26 = vector.multi_reduction <add>, %25, %cst_18 [1] : vector<8x512xf32> to vector<8xf32>
      %27 = vector.shape_cast %26 : vector<8xf32> to vector<8x1xf32>
      %28 = arith.addf %24, %27 : vector<8x1xf32>
      %c0_19 = arith.constant 0 : index
      %c0_20 = arith.constant 0 : index
      %29 = vector.load %arg6[%c0_19, %c0_20] : memref<8x1xf32, #tpu.memory_space<vmem>>, vector<8x1xf32>
      tpu.vector_store %arg6[%c0_19, %c0_20], %28 {strides = array<i32>} : memref<8x1xf32, #tpu.memory_space<vmem>>, vector<8x1xf32>,
    } else {
    }
    %c1_i32 = arith.constant 1 : i32
    %11 = arith.cmpi eq, %arg0, %c1_i32 : i32
    %c0_i32_7 = arith.constant 0 : i32
    %12 = arith.cmpi eq, %arg1, %c0_i32_7 : i32
    %13 = arith.andi %11, %12 : i1
    %14 = arith.extui %13 : i1 to i32
    %c0_i32_8 = arith.constant 0 : i32
    %15 = arith.cmpi ne, %14, %c0_i32_8 : i32
    scf.if %15 {
      %c0_11 = arith.constant 0 : index
      %c0_12 = arith.constant 0 : index
      %19 = vector.load %arg5[%c0_11, %c0_12] : memref<8x1xf32, #tpu.memory_space<vmem>>, vector<8x1xf32>
      %cst_13 = arith.constant 0.00255102036 : f32
      %20 = vector.broadcast %cst_13 : f32 to vector<8x1xf32>
      %21 = arith.mulf %19, %20 : vector<8x1xf32>
      %c0_14 = arith.constant 0 : index
      %c0_15 = arith.constant 0 : index
      %22 = vector.load %arg6[%c0_14, %c0_15] : memref<8x1xf32, #tpu.memory_space<vmem>>, vector<8x1xf32>
      %cst_16 = arith.constant 0.00255102036 : f32
      %23 = vector.broadcast %cst_16 : f32 to vector<8x1xf32>
      %24 = arith.mulf %22, %23 : vector<8x1xf32>
      %25 = arith.mulf %21, %21 : vector<8x1xf32>
      %26 = arith.subf %24, %25 : vector<8x1xf32>
      %cst_17 = arith.constant 0.000000e+00 : f32
      %27 = vector.broadcast %cst_17 : f32 to vector<8x1xf32>
      %28 = arith.maximumf %26, %27 : vector<8x1xf32>
      %c0_18 = arith.constant 0 : index
      %c0_19 = arith.constant 0 : index
      %29 = vector.load %arg5[%c0_18, %c0_19] : memref<8x1xf32, #tpu.memory_space<vmem>>, vector<8x1xf32>
      tpu.vector_store %arg5[%c0_18, %c0_19], %21 {strides = array<i32>} : memref<8x1xf32, #tpu.memory_space<vmem>>, vector<8x1xf32>,
      %cst_20 = arith.constant 9.99999974E-6 : f32
      %30 = vector.broadcast %cst_20 : f32 to vector<8x1xf32>
      %31 = arith.addf %28, %30 : vector<8x1xf32>
      %32 = math.rsqrt %31 : vector<8x1xf32>
      %c0_21 = arith.constant 0 : index
      %c0_22 = arith.constant 0 : index
      %33 = vector.load %arg6[%c0_21, %c0_22] : memref<8x1xf32, #tpu.memory_space<vmem>>, vector<8x1xf32>
      tpu.vector_store %arg6[%c0_21, %c0_22], %32 {strides = array<i32>} : memref<8x1xf32, #tpu.memory_space<vmem>>, vector<8x1xf32>,
    } else {
    }
    %c1_i32_9 = arith.constant 1 : i32
    %16 = arith.cmpi eq, %arg0, %c1_i32_9 : i32
    %17 = arith.extui %16 : i1 to i32
    %c0_i32_10 = arith.constant 0 : i32
    %18 = arith.cmpi ne, %17, %c0_i32_10 : i32
    scf.if %18 {
      %c0_11 = arith.constant 0 : index
      %c0_12 = arith.constant 0 : index
      %19 = vector.load %arg5[%c0_11, %c0_12] : memref<8x1xf32, #tpu.memory_space<vmem>>, vector<8x1xf32>
      %20 = vector.broadcast %19 : vector<8x1xf32> to vector<8x512xf32>
      %21 = arith.subf %7, %20 : vector<8x512xf32>
      %c0_13 = arith.constant 0 : index
      %c0_14 = arith.constant 0 : index
      %22 = vector.load %arg6[%c0_13, %c0_14] : memref<8x1xf32, #tpu.memory_space<vmem>>, vector<8x1xf32>
      %23 = vector.broadcast %22 : vector<8x1xf32> to vector<8x512xf32>
      %24 = arith.mulf %21, %23 : vector<8x512xf32>
      %cst_15 = arith.constant 0.000000e+00 : f32
      %25 = vector.broadcast %cst_15 : f32 to vector<8x512xf32>
      %26 = arith.cmpf oge, %24, %25 : vector<8x512xf32>
      %cst_16 = arith.constant 1.000000e-01 : f32
      %27 = vector.broadcast %cst_16 : f32 to vector<8x512xf32>
      %28 = arith.mulf %27, %24 : vector<8x512xf32>
      %29 = arith.select %26, %24, %28 : vector<8x512xi1>, vector<8x512xf32>
      %c0_17 = arith.constant 0 : index
      %c0_18 = arith.constant 0 : index
      %30 = vector.load %arg4[%c0_17, %c0_18] : memref<8x512xf32, #tpu.memory_space<vmem>>, vector<8x512xf32>
      tpu.vector_store %arg4[%c0_17, %c0_18], %29 {strides = array<i32>} : memref<8x512xf32, #tpu.memory_space<vmem>>, vector<8x512xf32>,
    } else {
    }
    return
  }
  func.func @transform_0(%arg0: i32, %arg1: i32) -> (i32, i32) {
    %c0_i32 = arith.constant 0 : i32
    %c0_i32_0 = arith.constant 0 : i32
    %c0_i32_1 = arith.constant 0 : i32
    return %c0_i32, %c0_i32_0 : i32, i32
  }
  func.func @transform_1(%arg0: i32, %arg1: i32) -> (i32, i32) {
    %c0_i32 = arith.constant 0 : i32
    %c0_i32_0 = arith.constant 0 : i32
    return %c0_i32, %arg1 : i32, i32
  }
  func.func @transform_2(%arg0: i32, %arg1: i32) -> (i32, i32) {
    %0 = arith.muli %arg1, %arg0 : i32
    %c0_i32 = arith.constant 0 : i32
    %c0_i32_0 = arith.constant 0 : i32
    return %c0_i32, %0 : i32, i32
  }
}

</mosaic_0001>

<bundles_post_ra>
// kernel: tpu_custom_call.1
= control target key start
LH: loop header
LB: loop body
LE: loop exit
PB: predicated region body
PF: predicated region fallthrough
CT: control target
= control target key end

     0   :  { %7 = vsyncpa [#allocation5], 0  ;;  %s933_s0 = inlined_call_operand.hbm [shape: bf16[8,36], index: 0, kind: input, shape index: {}]   ;;  %s934_s1 = inlined_call_operand.hbm [shape: bf16[36,512], index: 1, kind: input, shape index: {}]   ;;  %s935_s2 = inlined_call_operand.hbm [shape: f32[8,512], index: 2, kind: output, shape index: {}]  }
   0x1   :  { %8 = vsyncpa [#allocation8], 0 }
   0x2   :  { %9 = vsyncpa [#allocation6], 0 }
   0x3   :  { %11 = vsyncpa [#allocation6 + $0x1], 0  ;;  %s776_s9 = smov 0   ;;  %s778_s10 = smov 0  }
   0x4   :  { %s780_s11 = smov 0  }
   0x5 LB: > { %s520_s12 = sadd.s32 4294967295, %s751_s11   ;;  %s521_s13 = sadd.s32 4294967294, %s751_s11   ;;  %s751_s11 = sphi %s780_s11, %s17_s11   ;;  %s747_s10 = sphi %s778_s10, %s946_s10   ;;  %s743_s9 = sphi %s776_s9, %s945_s9  }
   0x6   : > { %s29_s14 = sadd.s32 1, %s747_s10  ;;  %p522_p0 = scmp.ge.s32.totalorder %s751_s11, 1 }
   0x7   : > { %p31_p1 = scmp.ge.s32.totalorder %s29_s14, 2  ;;  %p109_p2 = scmp.lt.s32.totalorder %s751_s11, 3 }
   0x8   : > { %p798_p3 = scmp.eq.s32.totalorder %s520_s12, 0  ;;  %s753_s17 = smov [#allocation4]  }
   0x9   : > { %s948_s14 = smov (%p31_p1, %s29_s14), 0  ;;  %p804_p4 = pnand %p522_p0, %p109_p2 }
   0xa   : > { %s939_s15 = scalar_select %p798_p3, 1, 0 }
   0xb   : > { %s940_s16 = scalar_select %p804_p4, 1, 0 }
   0xc   : > { %s122_s18 = sshll.u32 %s753_s17, 4  ;;  %p566_p5 = pneg %p804_p4  ;;  %s123_s18 = int_to_ptr.vmem [resolvable:$true] %s122_s18 }
   0xd   : > { %s754_s19 = smov [#allocation7]   ;;  %s635_s24 = scalar_lea.hbm %s933_s0, 64 }
   0xe   : > { %s135_s20 = sshll.u32 %s754_s19, 4  ;;  %p812_p6 = pnand %p798_p3, %p566_p5  ;;  %s816_s20 = int_to_ptr.vmem [resolvable:$true] %s135_s20 }
   0xf   : > { %p636_p7 = scmp.ne.s32.totalorder %s933_s0, %s635_s24  ;;  %p642_p11 = scmp.lt.u32.totalorder %s635_s24, %s933_s0 }
  0x10   : > { %p637_p8 = pneg %p812_p6 }
  0x12   : > { %p638_p9 = pnand %p637_p8, %p636_p7 }
  0x14   : > { %p639_p10 = pneg %p638_p9 }
  0x16   : > { %p644_p12 = pnand %p642_p11, %p639_p10 }
  0x18   : > { %647 = shalt.err (!%p644_p12)
}
  0x19   : > { %s648_s29 = scalar_lea.vmem %s123_s18, 64  ;;  %p656_p2 = scmp.lt.s32.totalorder %s123_s18, %s123_s18 }
  0x1a   : > { %p649_p13 = scmp.ne.s32.totalorder %s123_s18, %s648_s29  ;;  %p657_p5 = scmp.lt.s32.totalorder %s648_s29, %s648_s29 }
  0x1c   : > { %p651_p0 = pnand %p649_p13, %p637_p8  ;;  %p658_p3 = por %p657_p5, %p656_p2 }
  0x1e   : > { %p652_p1 = pneg %p651_p0 }
  0x20   : > { %p659_p4 = pnand %p658_p3, %p652_p1 }
  0x22   : > { %662 = shalt.err (!%p659_p4)
}
  0x23   : > { %569 = dma.hbm_to_vmem [thread:$0]  (!%p812_p6), %s933_s0, 64, %s123_s18, [#allocation5]  }
  0x24   : > { %s663_s6 = scalar_lea.hbm %s934_s1, 1280 }
  0x25   : > { %p664_p7 = scmp.ne.s32.totalorder %s934_s1, %s663_s6  ;;  %p670_p4 = scmp.lt.u32.totalorder %s663_s6, %s934_s1 }
  0x27   : > { %p666_p9 = pnand %p664_p7, %p637_p8 }
  0x29   : > { %p667_p3 = pneg %p666_p9 }
  0x2b   : > { %p672_p10 = pnand %p670_p4, %p667_p3 }
  0x2d   : > { %675 = shalt.err (!%p672_p10)
}
  0x2e   : > { %s676_s18 = scalar_lea.vmem %s816_s20, 1280  ;;  %p684_p0 = scmp.lt.s32.totalorder %s816_s20, %s816_s20 }
  0x2f   : > { %p677_p11 = scmp.ne.s32.totalorder %s816_s20, %s676_s18  ;;  %p685_p1 = scmp.lt.s32.totalorder %s676_s18, %s676_s18 }
  0x31   : > { %p679_p12 = pnand %p677_p11, %p637_p8  ;;  %p686_p2 = por %p685_p1, %p684_p0 }
  0x33   : > { %p680_p13 = pneg %p679_p12 }
  0x35   : > { %p687_p5 = pnand %p686_p2, %p680_p13 }
  0x37   : > { %690 = shalt.err (!%p687_p5)
}
  0x38   : > { %s755_s22 = smov 256   ;;  %s756_s23 = smov 16  }
  0x39   : > { %572 = dma.hbm_to_vmem [thread:$0]  (!%p812_p6), %s934_s1, 1280, %s816_s20, [#allocation8], %s755_s22, %s755_s22, %s756_s23  }
  0x3a   : > { %p942_p7 = scmp.ne.s32.totalorder %s940_s16, 0 }
  0x3b   : > { %p943_p8 = scmp.ne.s32.totalorder (!%p942_p7), %s939_s15, 0 }
  0x3c   : > { %151 = sbr.rel (%p942_p7) target bundleno = 655 (0x28f), region = 28 }
  0x43   : > { %730 = dma.done.wait (%p943_p8), [#allocation5], 64  }
  0x44   : > { %732 = vsyncadd (%p943_p8), [#allocation5], 4294967232 }
  0x45   : > { %734 = dma.done.wait (%p943_p8), [#allocation8], 1280  }
  0x46   : > { %736 = vsyncadd (%p943_p8), [#allocation8], 4294966016  ;;  %p176_p9 = scmp.eq.s32.totalorder %s743_s9, 0 }
  0x47   : > { %vm182_vm0 = vcmask (%p176_p9), 7168   ;;  %v757_v0 = vmov (%p176_p9), 0.0  }
  0x48   : > { %181 = sbr.rel (!%p176_p9) target bundleno = 79 (0x4f), region = 40  ;;  %183 = vst.msk [vmem:[#allocation2] sm:$0xff] (%p176_p9), %vm182_vm0, %v757_v0  ;;  %184 = vst.msk [vmem:[#allocation3] sm:$0xff] (%p176_p9), %vm182_vm0, %v757_v0 }
  0x4f PF: > { %v616_v1 = vld [vmem:[#allocation7 + $0x4] ss:$16 sps:$4 sm:$0xff]   ;;  %v618_v2 = vld [vmem:[#allocation7 + $0xc] ss:$16 sps:$4 sm:$0xff]   ;;  %v758_v3 = vmov 0   ;;  %vm250_vm1 = vcmask 1041408  }
  0x50   : > { %295 = vmatprep.mubr.bf16.mxu0 %v758_v3  ;;  %336 = vmatprep.mubr.bf16.mxu1 %v758_v3  ;;  %v620_v4 = vld [vmem:[#allocation7] ss:$16 sps:$4 sm:$0xff]   ;;  %v621_v5 = vld [vmem:[#allocation7 + $0x8] ss:$16 sps:$4 sm:$0xff]   ;;  %v622_v6 = vld [vmem:[#allocation7 + $0x24] ss:$16 sps:$4 sm:$0xff]  }
  0x51   : > { %263 = vmatprep.subr.bf16.mxu0 %v616_v1  ;;  %304 = vmatprep.subr.bf16.mxu1 %v618_v2  ;;  %v624_v7 = vld [vmem:[#allocation7 + $0x2c] ss:$16 sps:$4 sm:$0xff]   ;;  %v626_v8 = vld [vmem:[#allocation7 + $0x20] ss:$16 sps:$4 sm:$0xff]   ;;  %v627_v9 = vld [vmem:[#allocation7 + $0x28] ss:$16 sps:$4 sm:$0xff]  }
  0x52   : > { %264 = vmatpush1.bf16.msra.mxu0 %v620_v4  ;;  %305 = vmatpush1.bf16.msra.mxu1 %v621_v5  ;;  %v194_v10 = vld [vmem:[#allocation7 + $0x40] sm:$0x33]  ;;  %v195_v11 = vld [vmem:[#allocation7 + $0x48] sm:$0x33]  ;;  %v185_v18 = vld [vmem:[#allocation4] sm:$0xf] }
  0x53   : > { %265 = vmatprep.subr.bf16.mxu0 %v622_v6  ;;  %306 = vmatprep.subr.bf16.mxu1 %v624_v7  ;;  %v538_v12 = vcombine.high %v194_v10, %v194_v10  ;;  %v540_v13 = vcombine.high %v195_v11, %v195_v11  ;;  %v537_v14 = vcombine.low %v194_v10, %v194_v10  ;;  %vm246_vm2 = vcmask 293888   ;;  %p545_p6 = scmp.ne.s32.totalorder %s743_s9, 0 }
  0x54   : > { %v539_v15 = vcombine.low %v195_v11, %v195_v11  ;;  %v348_v37 = vld [vmem:[#allocation2] sm:$0xff] (!%p545_p6)  ;;  %vm355_vm3 = vcmask (!%p545_p6), 7168   ;;  %v357_v40 = vld [vmem:[#allocation3] sm:$0xff] (!%p545_p6) }
  0x55   : > { %v252_v16 = vsel %vm250_vm1, %v537_v14, 0 }
  0x56   : > { %266 = vmatpush1.bf16.msra.mxu0 %v626_v8  ;;  %307 = vmatpush1.bf16.msra.mxu1 %v627_v9  ;;  %v258_v17 = vsel %vm250_vm1, %v539_v15, 0 }
  0x57   : > { %541 = vmatprep.subr.msk.bf16.mxu0 %vm250_vm1, %v538_v12  ;;  %543 = vmatprep.subr.msk.bf16.mxu1 %vm250_vm1, %v540_v13 }
  0x5a   : > { %268 = vmatpush1.bf16.msra.mxu0 %v252_v16  ;;  %309 = vmatpush1.bf16.msra.mxu1 %v258_v17 }
  0x5d   : > { %542 = vmatmul.mubr.msk.bf16.vlgmr.msra.gmra.mrb[0].mxu0 %vm246_vm2, %v185_v18  ;;  %544 = vmatmul.mubr.msk.bf16.vlgmr.msra.gmra.mrb[0].mxu1 %vm246_vm2, %v185_v18 }
 0x12d   : > { %347 = sbr.rel (%p545_p6) target bundleno = 461 (0x1cd), region = 44 }
 0x130   : > { %v876_v19 = vpop.f32.mrb[0].mxu0  ;;  %v878_v20 = vpop.f32.mrb[0].mxu1 }
 0x131   : > { %v299_v21 = vpop.f32.mrb[1].mxu0  ;;  %v880_v22 = vpop.f32.mrb[1].mxu1  ;;  %v358_v28 = vmul.f32 (!%p545_p6), %v876_v19, %v876_v19  ;;  %v360_v30 = vmul.f32 (!%p545_p6), %v878_v20, %v878_v20 }
 0x132   : > { %v301_v23 = vpop.f32.mrb[2].mxu0  ;;  %v342_v24 = vpop.f32.mrb[2].mxu1  ;;  %v349_v27 = vadd.f32 (!%p545_p6), %v299_v21, %v876_v19  ;;  %v359_v29 = vmul.f32 (!%p545_p6), %v299_v21, %v299_v21  ;;  %v361_v32 = vmul.f32 (!%p545_p6), %v880_v22, %v880_v22 }
 0x133   : > { %v302_v25 = vpop.f32.mrb[3].mxu0  ;;  %v343_v26 = vpop.f32.mrb[3].mxu1 }
 0x134   : > { %v350_v31 = vadd.f32 %v349_v27, %v878_v20  ;;  %v362_v33 = vadd.f32 %v359_v29, %v358_v28 }
 0x136   : > { %v351_v34 = vadd.f32 %v350_v31, %v880_v22  ;;  %v363_v35 = vadd.f32 %v362_v33, %v360_v30 }
 0x138   : > { %352 = vadd.xlane.f32.xlu0 %v351_v34  ;;  %v364_v36 = vadd.f32 %v363_v35, %v361_v32 }
 0x13c   : > { %365 = vadd.xlane.f32.xlu0 %v364_v36 }
 0x1c5   : > { %v353_v38 = vpop.xlane.xlu0 %352 }
 0x1c6   : > { %v354_v39 = vadd.f32 %v353_v38, %v348_v37 }
 0x1c8   : > { %356 = vst.msk [vmem:[#allocation2] sm:$0xff] %vm355_vm3, %v354_v39 }
 0x1c9   : > { %v366_v41 = vpop.xlane.xlu0 %365 }
 0x1ca   : > { %v367_v42 = vadd.f32 %v366_v41, %v357_v40 }
 0x1cc   : > { %368 = vst.msk [vmem:[#allocation3] sm:$0xff] %vm355_vm3, %v367_v42 }
 0x1cd PF: > { %p369_p3 = scmp.eq.s32.totalorder %s743_s9, 1 }
 0x1ce   : > { %vm381_vm4 = vcmask (%p369_p3), 7168  }
 0x1cf   : > { %373 = sbr.rel (!%p369_p3) target bundleno = 488 (0x1e8), region = 48  ;;  %v374_v43 = vld [vmem:[#allocation2] sm:$0xff] (%p369_p3) }
 0x1d0   : > { %v375_v45 = vmul.f32 (%p369_p3), 0.0025510204, %v374_v43 }
 0x1d2   : > { %v378_v47 = vmul.f32 (%p369_p3), %v375_v45, %v375_v45  ;;  %382 = vst.msk [vmem:[#allocation2] sm:$0xff] (%p369_p3), %vm381_vm4, %v375_v45 }
 0x1d3   : > { %v376_v44 = vld [vmem:[#allocation3] sm:$0xff] (%p369_p3) }
 0x1d4   : > { %v377_v46 = vmul.f32 (%p369_p3), 0.0025510204, %v376_v44 }
 0x1d6   : > { %v379_v48 = vsub.f32 %v377_v46, %v378_v47 }
 0x1d8   : > { %v380_v49 = vmax.f32 %v379_v48, 0.0 }
 0x1da   : > { %v383_v50 = vadd.f32 1e-05, %v380_v49 }
 0x1dc   : > { %632 = vrsqrt.f32 %v383_v50 }
 0x1e6   : > { %v633_v51 = vpop.eup %632 }
 0x1e7   : > { %385 = vst.msk [vmem:[#allocation3] sm:$0xff] %vm381_vm4, %v633_v51 }
 0x1e8 PF: > { %p547_p4 = scmp.ne.s32.totalorder %s743_s9, 1 }
 0x1e9   : > { %v759_v53 = vmov (!%p547_p4), 0  }
 0x1ea   : > { %388 = sbr.rel (%p547_p4) target bundleno = 632 (0x278), region = 52  ;;  %634 = vset.pattern.permute.xlu0 (!%p547_p4), %v759_v53 }
 0x1eb   : > { %v389_v52 = vld [vmem:[#allocation2] sm:$0xff] (!%p547_p4) }
 0x1ec   : > { %392 = vperm.xlu0 (!%p547_p4), %634, %v389_v52  }
 0x1ee   : > { %v399_v54 = vld [vmem:[#allocation3] sm:$0xff] (!%p547_p4) }
 0x1f0   : > { %402 = vperm.xlu0 (!%p547_p4), %634, %v399_v54  }
 0x26b   : > { %v393_v55 = vpop.permute.xlu0 %392 }
 0x26c   : > { %v395_v56 = vsub.f32 %v876_v19, %v393_v55  ;;  %v396_v57 = vsub.f32 %v299_v21, %v393_v55  ;;  %v397_v58 = vsub.f32 %v878_v20, %v393_v55  ;;  %v398_v59 = vsub.f32 %v880_v22, %v393_v55 }
 0x26f   : > { %v403_v60 = vpop.permute.xlu0 %402 }
 0x270   : > { %v405_v61 = vmul.f32 %v403_v60, %v395_v56  ;;  %v406_v62 = vmul.f32 %v403_v60, %v396_v57  ;;  %v407_v63 = vmul.f32 %v403_v60, %v397_v58  ;;  %v408_v0 = vmul.f32 %v403_v60, %v398_v59 }
 0x272   : > { %vm409_vm5 = vcmp.ge.f32.partialorder %v405_v61, 0.0  ;;  %vm410_vm6 = vcmp.ge.f32.partialorder %v406_v62, 0.0  ;;  %vm411_vm7 = vcmp.ge.f32.partialorder %v407_v63, 0.0  ;;  %vm412_vm8 = vcmp.ge.f32.partialorder %v408_v0, 0.0 }
 0x273   : > { %v413_v1 = vmul.f32 0.1, %v405_v61  ;;  %v414_v2 = vmul.f32 0.1, %v406_v62  ;;  %v415_v3 = vmul.f32 0.1, %v407_v63 }
 0x274   : > { %v416_v4 = vmul.f32 0.1, %v408_v0 }
 0x275   : > { %v417_v5 = vsel %vm409_vm5, %v405_v61, %v413_v1  ;;  %v418_v6 = vsel %vm410_vm6, %v406_v62, %v414_v2  ;;  %v419_v7 = vsel %vm411_vm7, %v407_v63, %v415_v3 }
 0x276   : > { %v420_v8 = vsel %vm412_vm8, %v408_v0, %v416_v4  ;;  %421 = vst [vmem:[#allocation9] sm:$0xff] %v417_v5  ;;  %422 = vst [vmem:[#allocation9 + $0x8] sm:$0xff] %v418_v6 }
 0x277   : > { %423 = vst [vmem:[#allocation9 + $0x10] sm:$0xff] %v419_v7  ;;  %424 = vst [vmem:[#allocation9 + $0x18] sm:$0xff] %v420_v8 }
 0x278 PF: > { %p899_p10 = scmp.eq.s32.totalorder %s520_s12, 1  ;;  %s760_s15 = smov [#allocation9]  }
 0x279   : > { %s441_s16 = sshll.u32 %s760_s15, 4  ;;  %s442_s16 = int_to_ptr.vmem [resolvable:$true] %s441_s16 }
 0x27a   : > { %s691_s20 = scalar_lea.vmem %s442_s16, 512  ;;  %s697_s21 = scalar_lea.vmem %s442_s16, 1024 }
 0x27b   : > { %p692_p11 = scmp.ne.s32.totalorder %s442_s16, %s691_s20  ;;  %p698_p0 = scmp.lt.s32.totalorder %s442_s16, %s442_s16 }
 0x27c   : > { %p699_p1 = scmp.lt.s32.totalorder %s697_s21, %s691_s20 }
 0x27d   : > { %p693_p12 = pnand %p692_p11, %p899_p10 }
 0x27e   : > { %p700_p2 = por %p699_p1, %p698_p0 }
 0x27f   : > { %p694_p13 = pneg %p693_p12 }
 0x281   : > { %p701_p5 = pnand %p700_p2, %p694_p13 }
 0x283   : > { %704 = shalt.err (!%p701_p5)
}
 0x284   : > { %s705_s27 = scalar_lea.hbm %s935_s2, 512 }
 0x285   : > { %p706_p7 = scmp.ne.s32.totalorder %s935_s2, %s705_s27  ;;  %p711_p6 = scmp.lt.u32.totalorder %s705_s27, %s935_s2 }
 0x287   : > { %p707_p8 = pnand %p706_p7, %p899_p10 }
 0x289   : > { %p708_p9 = pneg %p707_p8 }
 0x28b   : > { %p713_p3 = pnand %p711_p6, %p708_p9 }
 0x28d   : > { %716 = shalt.err (!%p713_p3)
}
 0x28e   : > { %563 = dma.vmem_to_hbm [thread:$0]  (%p899_p10), %s442_s16, 512, %s935_s2, [#allocation6]  }
 0x28f PF: > { %p582_p4 = scmp.ge.s32.totalorder %s751_s11, 2  ;;  %p583_p11 = scmp.eq.s32.totalorder %s521_s13, 1 }
 0x291   : > { %p574_p12 = pnand %p583_p11, %p582_p4 }
 0x293   : > { %738 = dma.done.wait (!%p574_p12), [#allocation6], 512  }
 0x294   : > { %740 = vsyncadd (!%p574_p12), [#allocation6], 4294966784  ;;  %s17_s11 = sadd.s32 1, %s751_s11   ;;  %s945_s9 = smov %s747_s10 }
 0x295   : > { %p14_p13 = scmp.ge.s32.totalorder %s17_s11, 4   ;;  %s946_s10 = smov %s948_s14 }
 0x297   :  { %16 = sbr.rel (!%p14_p13) target bundleno = 5 (0x5), region = 86 }
 0x29e   :  { %459 = vsyncpa [#allocation5], 1 }
 0x29f   :  { %461 = vsyncpa [#allocation5 + $0x1], 1 }
 0x2a0   :  { %462 = vsyncpa [#allocation8], 1 }
 0x2a1   :  { %463 = vsyncpa [#allocation6], 1 }
 0x2a2   :  { %465 = vsyncpa [#allocation6 + $0x1], 1 }

</bundles_post_ra>
